<compile_context>
chip_gen: v5e
topology: v5e:2x2
jax: 0.10.0
libtpu: 0.0.40
codegen_flags: <defaults>
</compile_context>

<pallas_src>
import functools

import jax
import jax.numpy as jnp
from jax import lax
from jax.experimental import pallas as pl
from jax.experimental.pallas import tpu as pltpu


_LANE = 128
_TILE_BYTES_CAP = 2 * 1024 * 1024   # per-buffer tile cap, f32-accounted


def _round_up(x, m):
    return ((x + m - 1) // m) * m


def _sublane_unit(dtype):
    itemsize = jnp.dtype(dtype).itemsize
    return max(8, 32 // max(itemsize, 1))   # 8 (f32) / 16 (bf16) / 32 (int8/fp8)


def _vmem_plan():
    """(vmem_limit_bytes to request, per-buffer tile byte cap, min grid steps)."""
    try:
        cap = int(pltpu.get_tpu_info().vmem_capacity_bytes)
    except Exception:
        cap = 64 * 1024 * 1024                       # conservative (v7x-sized)
    two_tc = cap <= 64 * 1024 * 1024                 # v7x: 64 MiB per TC, 2 TCs/chip
    limit = min(cap // 2, 64 * 1024 * 1024)          # modest scoped-VMEM request
    min_steps = 4 if two_tc else 2
    return int(limit), _TILE_BYTES_CAP, int(min_steps)


def _pick_tile(extent, unit, bytes_per_row, tile_cap, min_steps):
    """Tile length along one axis: multiple of `unit`, ~tile_cap bytes per buffer,
    and (when the problem is big enough) leaving >= min_steps grid steps."""
    t = max(unit, (tile_cap // max(bytes_per_row, 1)) // unit * unit)
    if min_steps > 1 and extent > min_steps * unit:
        t = min(t, _round_up(pl.cdiv(extent, min_steps), unit))
    if t >= extent:
        return int(extent)                           # full extent: always legal
    return int(max(unit, (t // unit) * unit))


# ---------------------------------------------------------------------------
# channels_last, C < 128 and 128 % C == 0: packed lane-dense path.
# k = 128 // C logical rows share one 128-wide lane row; per-row statistics
# are segmented reductions over aligned groups of C lanes (exact f32
# butterfly built from XLU rolls + VPU selects).
# ---------------------------------------------------------------------------
def _ln_packed_kernel(x_ref, w_ref, b_ref, o_ref, *, eps, c):
    x = x_ref[...].astype(jnp.float32)                       # (tm, 128)
    lane = lax.broadcasted_iota(jnp.int32, x.shape, 1)

    def seg_sum(v):
        # After log2(c) butterfly steps every lane holds the sum of its
        # aligned c-lane segment.  Rolls run on the XLU, selects/adds on the
        # VPU -- both off the HBM critical path of this mem-bound kernel.
        s = v
        d = 1
        while d < c:
            fwd = pltpu.roll(s, shift=_LANE - d, axis=1)     # s[lane + d]
            bwd = pltpu.roll(s, shift=d, axis=1)             # s[lane - d]
            s = s + jnp.where((lane & d) == 0, fwd, bwd)
            d *= 2
        return s

    inv_c = 1.0 / c
    mean = seg_sum(x) * inv_c
    xc = x - mean
    var = seg_sum(xc * xc) * inv_c                           # biased var (torch)
    inv = lax.rsqrt(var + eps)                               # EUP
    w = w_ref[...].astype(jnp.float32)                       # (1, 128), tiled
    b = b_ref[...].astype(jnp.float32)
    o_ref[...] = (xc * inv * w + b).astype(o_ref.dtype)


# ---------------------------------------------------------------------------
# channels_last, plain path (C >= 128, or C does not pack into 128 lanes).
# ---------------------------------------------------------------------------
def _ln_rows_kernel(x_ref, w_ref, b_ref, o_ref, *, eps):
    x = x_ref[...].astype(jnp.float32)                       # (tm, C)
    mean = jnp.mean(x, axis=-1, keepdims=True)
    xc = x - mean
    var = jnp.mean(xc * xc, axis=-1, keepdims=True)          # biased var (torch)
    inv = lax.rsqrt(var + eps)                               # EUP
    w = w_ref[...].astype(jnp.float32)
    b = b_ref[...].astype(jnp.float32)
    o_ref[...] = (xc * inv * w + b).astype(o_ref.dtype)


def _layernorm_channels_last(x2d, weight, bias, eps):
    R, C = x2d.shape
    limit, tile_cap, min_steps = _vmem_plan()
    sub = _sublane_unit(x2d.dtype)
    itemsize = jnp.dtype(x2d.dtype).itemsize

    k = _LANE // C if (0 < C < _LANE and _LANE % C == 0) else 0
    if k > 1 and R % k == 0:
        # ---- packed path: (tm, 128) lane-dense tiles, contiguous DMAs ----
        Rp = R // k
        xp = x2d.reshape(Rp, _LANE)                          # free reshape
        w_t = jnp.tile(weight.reshape(-1), k).reshape(1, _LANE)
        b_t = jnp.tile(bias.reshape(-1), k).reshape(1, _LANE)
        tm = _pick_tile(Rp, sub, _LANE * 4, tile_cap, min_steps)
        kernel = functools.partial(_ln_packed_kernel, eps=eps, c=C)
        cost = pl.CostEstimate(flops=10 * R * C, transcendentals=R,
                               bytes_accessed=2 * R * C * itemsize)
        yp = pl.pallas_call(
            kernel,
            out_shape=jax.ShapeDtypeStruct((Rp, _LANE), x2d.dtype),
            grid_spec=pltpu.PrefetchScalarGridSpec(
                num_scalar_prefetch=0,
                grid=(pl.cdiv(Rp, tm),),
                in_specs=[
                    pl.BlockSpec((tm, _LANE), lambda i: (i, 0)),
                    pl.BlockSpec((1, _LANE), lambda i: (0, 0)),
                    pl.BlockSpec((1, _LANE), lambda i: (0, 0)),
                ],
                out_specs=pl.BlockSpec((tm, _LANE), lambda i: (i, 0)),
            ),
            compiler_params=pltpu.CompilerParams(
                dimension_semantics=("parallel",),
                vmem_limit_bytes=limit,
            ),
            cost_estimate=cost,
        )(xp, w_t, b_t)
        return yp.reshape(R, C)

    # ---- plain path ----
    # TODO(synk): pack via lcm(C, 128) lanes when C < 128 but 128 % C != 0.
    c_pad = _round_up(C, _LANE)                              # lane padding in VMEM
    tm = _pick_tile(R, sub, c_pad * 4, tile_cap, min_steps)
    kernel = functools.partial(_ln_rows_kernel, eps=eps)
    cost = pl.CostEstimate(flops=8 * R * C, transcendentals=R,
                           bytes_accessed=2 * R * C * itemsize)
    return pl.pallas_call(
        kernel,
        out_shape=jax.ShapeDtypeStruct((R, C), x2d.dtype),
        grid_spec=pltpu.PrefetchScalarGridSpec(
            num_scalar_prefetch=0,
            grid=(pl.cdiv(R, tm),),
            in_specs=[
                pl.BlockSpec((tm, C), lambda i: (i, 0)),
                pl.BlockSpec((1, C), lambda i: (0, 0)),
                pl.BlockSpec((1, C), lambda i: (0, 0)),
            ],
            out_specs=pl.BlockSpec((tm, C), lambda i: (i, 0)),
        ),
        compiler_params=pltpu.CompilerParams(
            dimension_semantics=("parallel",),
            vmem_limit_bytes=limit,
        ),
        cost_estimate=cost,
    )(x2d, weight.reshape(1, C), bias.reshape(1, C))


# ---------------------------------------------------------------------------
# channels_first: normalize over C of a (B, C, H*W) slab.  Channels sit on
# sublanes, spatial on lanes -> lane-dense loads/stores, no transposes.
# Several batch elements per grid step when C under-fills the sublanes.
# ---------------------------------------------------------------------------
def _ln_cf_kernel(x_ref, w_ref, b_ref, o_ref, *, eps, kb):
    w = w_ref[...].astype(jnp.float32)                       # (C, 1)
    b = b_ref[...].astype(jnp.float32)
    for i in range(kb):                                      # small static unroll
        x = x_ref[i].astype(jnp.float32)                     # (C, tw)
        mean = jnp.mean(x, axis=0, keepdims=True)            # (1, tw)
        xc = x - mean
        var = jnp.mean(xc * xc, axis=0, keepdims=True)       # biased var (torch)
        inv = lax.rsqrt(var + eps)                           # EUP
        o_ref[i] = (xc * inv * w + b).astype(o_ref.dtype)


def _layernorm_channels_first(x, weight, bias, eps):
    B, C, H, W = x.shape
    HW = H * W
    x3d = x.reshape(B, C, HW)                                # free reshape
    limit, tile_cap, min_steps = _vmem_plan()
    itemsize = jnp.dtype(x.dtype).itemsize
    sub = _sublane_unit(x.dtype)
    c_pad = _round_up(C, sub)                                # sublane padding

    # Batch elements per block: recover sublane/vreg utilization for tiny C.
    if C < sub:
        kb = int(min(B, max(1, sub // C)))
        while B % kb:                                        # keep blocks exact
            kb -= 1
    else:
        kb = 1

    # Spatial tile: lane aligned, sized from the padded-f32 per-buffer cap.
    bytes_per_col = kb * c_pad * 4
    tw = max(_LANE, (tile_cap // max(bytes_per_col, 1)) // _LANE * _LANE)
    nb = pl.cdiv(B, kb)
    if min_steps > 1 and nb < min_steps:
        want = pl.cdiv(min_steps, nb)
        if HW > want * _LANE:
            tw = min(tw, _round_up(pl.cdiv(HW, want), _LANE))
    if tw >= HW:
        tw = HW                                              # full spatial extent

    kernel = functools.partial(_ln_cf_kernel, eps=eps, kb=kb)
    cost = pl.CostEstimate(flops=8 * B * C * HW, transcendentals=B * HW,
                           bytes_accessed=2 * B * C * HW * itemsize)
    y3d = pl.pallas_call(
        kernel,
        out_shape=jax.ShapeDtypeStruct((B, C, HW), x.dtype),
        grid_spec=pltpu.PrefetchScalarGridSpec(
            num_scalar_prefetch=0,
            grid=(nb, pl.cdiv(HW, tw)),
            in_specs=[
                pl.BlockSpec((kb, C, tw), lambda b, j: (b, 0, j)),
                pl.BlockSpec((C, 1), lambda b, j: (0, 0)),
                pl.BlockSpec((C, 1), lambda b, j: (0, 0)),
            ],
            out_specs=pl.BlockSpec((kb, C, tw), lambda b, j: (b, 0, j)),
        ),
        compiler_params=pltpu.CompilerParams(
            dimension_semantics=("parallel", "parallel"),
            vmem_limit_bytes=limit,
        ),
        cost_estimate=cost,
    )(x3d, weight.reshape(C, 1), bias.reshape(C, 1))
    return y3d.reshape(B, C, H, W)


# ---------------------------------------------------------------------------
# Public wrapper matching the PyTorch module semantics.
# ---------------------------------------------------------------------------
def layer_norm(x, weight, bias, eps=1e-6, data_format="channels_last"):
    """Pallas LayerNorm.

    channels_last : x is (..., C), normalized over the trailing C axis.
    channels_first: x is (B, C, H, W), normalized over the channel axis (dim 1).
    eps default 1e-6 matches the given (ConvNeXt-style) module.
    """
    if data_format not in ("channels_last", "channels_first"):
        raise NotImplementedError(data_format)

    if data_format == "channels_last":
        C = x.shape[-1]
        lead = x.shape[:-1]
        y2d = _layernorm_channels_last(x.reshape(-1, C), weight, bias, eps)
        return y2d.reshape(*lead, C)
    return _layernorm_channels_first(x, weight, bias, eps)


# ---------------------------------------------------------------------------
# Reference + self-test
# ---------------------------------------------------------------------------
def _reference_layer_norm(x, weight, bias, eps, data_format):
    if data_format == "channels_last":
        mean = jnp.mean(x, axis=-1, keepdims=True)
        var = jnp.mean((x - mean) ** 2, axis=-1, keepdims=True)
        return (x - mean) / jnp.sqrt(var + eps) * weight + bias
    u = jnp.mean(x, axis=1, keepdims=True)
    s = jnp.mean((x - u) ** 2, axis=1, keepdims=True)
    xn = (x - u) / jnp.sqrt(s + eps)
    return weight[None, :, None, None] * xn + bias[None, :, None, None]


if __name__ == "__main__":
    key = jax.random.PRNGKey(0)
    k1, k2, k3 = jax.random.split(key, 3)
    eps = 1e-6

    # ---- channels_first: NCHW input, normalized_shape C = 4 ----
    C = 4
    x_cf = jax.random.normal(k1, (2, C, 16, 16), dtype=jnp.float32)
    w_cf = 0.5 + 0.1 * jnp.arange(C, dtype=jnp.float32)
    b_cf = 0.01 * jnp.arange(C, dtype=jnp.float32)
    y_cf = jax.block_until_ready(
        layer_norm(x_cf, w_cf, b_cf, eps=eps, data_format="channels_first"))
    ref_cf = _reference_layer_norm(x_cf, w_cf, b_cf, eps, "channels_first")
    assert jnp.allclose(y_cf, ref_cf, atol=1e-5, rtol=1e-5)

    # ---- channels_last, small C (packed lane-dense path): (2, 8, 8, 32) ----
    C2 = 32
    x_cl = jax.random.normal(k2, (2, 8, 8, C2), dtype=jnp.float32)
    w_cl = 0.5 + 0.05 * jnp.arange(C2, dtype=jnp.float32)
    b_cl = 0.01 * jnp.arange(C2, dtype=jnp.float32)
    y_cl = jax.block_until_ready(
        layer_norm(x_cl, w_cl, b_cl, eps=eps, data_format="channels_last"))
    ref_cl = _reference_layer_norm(x_cl, w_cl, b_cl, eps, "channels_last")
    assert jnp.allclose(y_cl, ref_cl, atol=1e-5, rtol=1e-5)

    # ---- channels_last, C = 128 (plain lane-dense path): (2, 4, 4, 128) ----
    C3 = 128
    x_cl2 = jax.random.normal(k3, (2, 4, 4, C3), dtype=jnp.float32)
    w_cl2 = 0.5 + 0.01 * jnp.arange(C3, dtype=jnp.float32)
    b_cl2 = 0.002 * jnp.arange(C3, dtype=jnp.float32)
    y_cl2 = jax.block_until_ready(
        layer_norm(x_cl2, w_cl2, b_cl2, eps=eps, data_format="channels_last"))
    ref_cl2 = _reference_layer_norm(x_cl2, w_cl2, b_cl2, eps, "channels_last")
    assert jnp.allclose(y_cl2, ref_cl2, atol=1e-5, rtol=1e-5)

    print("KERNEL_OK")
</pallas_src>

<mosaic_0001>
module attributes {stable_mosaic.version = 11 : i64} {
  func.func @_ln_cf_kernel(%arg0: i32, %arg1: i32, %arg2: memref<2x4x256xf32, #tpu.memory_space<vmem>>, %arg3: memref<4x1xf32, #tpu.memory_space<vmem>>, %arg4: memref<4x1xf32, #tpu.memory_space<vmem>>, %arg5: memref<2x4x256xf32, #tpu.memory_space<vmem>>) attributes {dimension_semantics = [#tpu.dimension_semantics<parallel>, #tpu.dimension_semantics<parallel>], iteration_bounds = array<i64: 1, 1>, scalar_prefetch = 0 : i64, scratch_operands = 0 : i64, tpu.core_type = #tpu.core_type<tc>, window_params = [{transform_indices = @transform_0, window_bounds = array<i64: 2, 4, 256>}, {pipeline_mode = #tpu.pipeline_mode<synchronous>, transform_indices = @transform_1, window_bounds = array<i64: 4, 1>}, {pipeline_mode = #tpu.pipeline_mode<synchronous>, transform_indices = @transform_2, window_bounds = array<i64: 4, 1>}, {transform_indices = @transform_3, window_bounds = array<i64: 2, 4, 256>}]} {
    %c0 = arith.constant 0 : index
    %c0_0 = arith.constant 0 : index
    %0 = vector.load %arg3[%c0, %c0_0] : memref<4x1xf32, #tpu.memory_space<vmem>>, vector<4x1xf32>
    %c0_1 = arith.constant 0 : index
    %c0_2 = arith.constant 0 : index
    %1 = vector.load %arg4[%c0_1, %c0_2] : memref<4x1xf32, #tpu.memory_space<vmem>>, vector<4x1xf32>
    %c0_3 = arith.constant 0 : index
    %c0_4 = arith.constant 0 : index
    %c0_5 = arith.constant 0 : index
    %2 = vector.load %arg2[%c0_3, %c0_4, %c0_5] : memref<2x4x256xf32, #tpu.memory_space<vmem>>, vector<1x4x256xf32>
    %3 = vector.shape_cast %2 : vector<1x4x256xf32> to vector<4x256xf32>
    %cst = arith.constant dense<0.000000e+00> : vector<256xf32>
    %4 = vector.multi_reduction <add>, %3, %cst [0] : vector<4x256xf32> to vector<256xf32>
    %5 = vector.shape_cast %4 : vector<256xf32> to vector<1x256xf32>
    %cst_6 = arith.constant 4.000000e+00 : f32
    %6 = vector.broadcast %cst_6 : f32 to vector<1x256xf32>
    %7 = arith.divf %5, %6 : vector<1x256xf32>
    %8 = vector.broadcast %7 : vector<1x256xf32> to vector<4x256xf32>
    %9 = arith.subf %3, %8 : vector<4x256xf32>
    %10 = arith.mulf %9, %9 : vector<4x256xf32>
    %cst_7 = arith.constant dense<0.000000e+00> : vector<256xf32>
    %11 = vector.multi_reduction <add>, %10, %cst_7 [0] : vector<4x256xf32> to vector<256xf32>
    %12 = vector.shape_cast %11 : vector<256xf32> to vector<1x256xf32>
    %cst_8 = arith.constant 4.000000e+00 : f32
    %13 = vector.broadcast %cst_8 : f32 to vector<1x256xf32>
    %14 = arith.divf %12, %13 : vector<1x256xf32>
    %cst_9 = arith.constant 9.99999997E-7 : f32
    %15 = vector.broadcast %cst_9 : f32 to vector<1x256xf32>
    %16 = arith.addf %14, %15 : vector<1x256xf32>
    %17 = math.rsqrt %16 : vector<1x256xf32>
    %18 = vector.broadcast %17 : vector<1x256xf32> to vector<4x256xf32>
    %19 = arith.mulf %9, %18 : vector<4x256xf32>
    %20 = vector.broadcast %0 : vector<4x1xf32> to vector<4x256xf32>
    %21 = arith.mulf %19, %20 : vector<4x256xf32>
    %22 = vector.broadcast %1 : vector<4x1xf32> to vector<4x256xf32>
    %23 = arith.addf %21, %22 : vector<4x256xf32>
    %c0_10 = arith.constant 0 : index
    %c0_11 = arith.constant 0 : index
    %c0_12 = arith.constant 0 : index
    %24 = vector.load %arg5[%c0_10, %c0_11, %c0_12] : memref<2x4x256xf32, #tpu.memory_space<vmem>>, vector<1x4x256xf32>
    %25 = vector.shape_cast %24 : vector<1x4x256xf32> to vector<4x256xf32>
    %26 = vector.shape_cast %23 : vector<4x256xf32> to vector<1x4x256xf32>
    tpu.vector_store %arg5[%c0_10, %c0_11, %c0_12], %26 {strides = array<i32>} : memref<2x4x256xf32, #tpu.memory_space<vmem>>, vector<1x4x256xf32>,
    %c1 = arith.constant 1 : index
    %c0_13 = arith.constant 0 : index
    %c0_14 = arith.constant 0 : index
    %27 = vector.load %arg2[%c1, %c0_13, %c0_14] : memref<2x4x256xf32, #tpu.memory_space<vmem>>, vector<1x4x256xf32>
    %28 = vector.shape_cast %27 : vector<1x4x256xf32> to vector<4x256xf32>
    %cst_15 = arith.constant dense<0.000000e+00> : vector<256xf32>
    %29 = vector.multi_reduction <add>, %28, %cst_15 [0] : vector<4x256xf32> to vector<256xf32>
    %30 = vector.shape_cast %29 : vector<256xf32> to vector<1x256xf32>
    %cst_16 = arith.constant 4.000000e+00 : f32
    %31 = vector.broadcast %cst_16 : f32 to vector<1x256xf32>
    %32 = arith.divf %30, %31 : vector<1x256xf32>
    %33 = vector.broadcast %32 : vector<1x256xf32> to vector<4x256xf32>
    %34 = arith.subf %28, %33 : vector<4x256xf32>
    %35 = arith.mulf %34, %34 : vector<4x256xf32>
    %cst_17 = arith.constant dense<0.000000e+00> : vector<256xf32>
    %36 = vector.multi_reduction <add>, %35, %cst_17 [0] : vector<4x256xf32> to vector<256xf32>
    %37 = vector.shape_cast %36 : vector<256xf32> to vector<1x256xf32>
    %cst_18 = arith.constant 4.000000e+00 : f32
    %38 = vector.broadcast %cst_18 : f32 to vector<1x256xf32>
    %39 = arith.divf %37, %38 : vector<1x256xf32>
    %cst_19 = arith.constant 9.99999997E-7 : f32
    %40 = vector.broadcast %cst_19 : f32 to vector<1x256xf32>
    %41 = arith.addf %39, %40 : vector<1x256xf32>
    %42 = math.rsqrt %41 : vector<1x256xf32>
    %43 = vector.broadcast %42 : vector<1x256xf32> to vector<4x256xf32>
    %44 = arith.mulf %34, %43 : vector<4x256xf32>
    %45 = vector.broadcast %0 : vector<4x1xf32> to vector<4x256xf32>
    %46 = arith.mulf %44, %45 : vector<4x256xf32>
    %47 = vector.broadcast %1 : vector<4x1xf32> to vector<4x256xf32>
    %48 = arith.addf %46, %47 : vector<4x256xf32>
    %c1_20 = arith.constant 1 : index
    %c0_21 = arith.constant 0 : index
    %c0_22 = arith.constant 0 : index
    %49 = vector.load %arg5[%c1_20, %c0_21, %c0_22] : memref<2x4x256xf32, #tpu.memory_space<vmem>>, vector<1x4x256xf32>
    %50 = vector.shape_cast %49 : vector<1x4x256xf32> to vector<4x256xf32>
    %51 = vector.shape_cast %48 : vector<4x256xf32> to vector<1x4x256xf32>
    tpu.vector_store %arg5[%c1_20, %c0_21, %c0_22], %51 {strides = array<i32>} : memref<2x4x256xf32, #tpu.memory_space<vmem>>, vector<1x4x256xf32>,
    return
  }
  func.func @transform_0(%arg0: i32, %arg1: i32) -> (i32, i32, i32) {
    %c0_i32 = arith.constant 0 : i32
    %c0_i32_0 = arith.constant 0 : i32
    return %arg0, %c0_i32, %arg1 : i32, i32, i32
  }
  func.func @transform_1(%arg0: i32, %arg1: i32) -> (i32, i32) {
    %c0_i32 = arith.constant 0 : i32
    %c0_i32_0 = arith.constant 0 : i32
    %c0_i32_1 = arith.constant 0 : i32
    return %c0_i32, %c0_i32_0 : i32, i32
  }
  func.func @transform_2(%arg0: i32, %arg1: i32) -> (i32, i32) {
    %c0_i32 = arith.constant 0 : i32
    %c0_i32_0 = arith.constant 0 : i32
    %c0_i32_1 = arith.constant 0 : i32
    return %c0_i32, %c0_i32_0 : i32, i32
  }
  func.func @transform_3(%arg0: i32, %arg1: i32) -> (i32, i32, i32) {
    %c0_i32 = arith.constant 0 : i32
    %c0_i32_0 = arith.constant 0 : i32
    return %arg0, %c0_i32, %arg1 : i32, i32, i32
  }
}

</mosaic_0001>

<bundles_post_ra>
// kernel: tpu_custom_call.1
= control target key start
LH: loop header
LB: loop body
LE: loop exit
PB: predicated region body
PF: predicated region fallthrough
CT: control target
= control target key end

     0   :  { %8 = vsyncpa [#allocation3], 0  ;;  %s405_s0 = inlined_call_operand.hbm [shape: f32[2,4,256], index: 0, kind: input, shape index: {}]   ;;  %s406_s1 = inlined_call_operand.vmem [shape: f32[4,1], index: 1, kind: input, shape index: {}]   ;;  %s407_s2 = inlined_call_operand.vmem [shape: f32[4,1], index: 2, kind: input, shape index: {}]   ;;  %s408_s3 = inlined_call_operand.hbm [shape: f32[2,4,256], index: 3, kind: output, shape index: {}]  }
   0x1   :  { %9 = vsyncpa [#allocation4], 0  ;;  %s14_s14 = sshll.u32 %s405_s0, 4  ;;  %s316_s15 = smov [#allocation2]   ;;  %s15_s14 = int_to_ptr.hbm [resolvable:$true] %s14_s14 }
   0x2   :  { %s16_s16 = sshll.u32 %s316_s15, 4  ;;  %s317_s17 = smov 128   ;;  %s17_s16 = int_to_ptr.vmem [resolvable:$true] %s16_s16 }
   0x3   :  { %s318_s18 = smov 8  }
   0x4   :  { %22 = dma.hbm_to_vmem [thread:$0]  %s15_s14, 256, %s17_s16, [#allocation3], %s317_s17, %s317_s17, %s318_s18  }
   0x5   :  { %312 = dma.done.wait [#allocation3], 256  }
   0x6   :  { %313 = vsyncadd [#allocation3], 4294967040  ;;  %v319_v0 = vmov 0   ;;  %v320_v1 = vmov 4.0   ;;  %v31_v3 = vld [vmem:[%s406_s1] sm:$0xf] }
   0x7   :  { %253 = vset.pattern.permute.xlu0 %v319_v0  ;;  %254 = vrcp.f32 %v320_v1  ;;  %v33_v4 = vld [vmem:[#allocation2] sm:$0xff]  ;;  %v32_v6 = vld [vmem:[%s407_s2] sm:$0xf]  ;;  %vm40_vm0 = vcmask 1043456   ;;  %v143_v33 = vld [vmem:[#allocation2 + $0x8] sm:$0xff]  ;;  %s322_s1 = smov [#allocation5]  }
   0x8   :  { %123 = vperm.xlu0 %253, %v31_v3   ;;  %35 = vst [vmem:[#allocation1] ss:$2 sm:$0xff] %v33_v4  ;;  %s231_s2 = sshll.u32 %s322_s1, 4  ;;  %s233_s24 = sshll.u32 %s408_s3, 4  ;;  %s232_s2 = int_to_ptr.vmem [resolvable:$true] %s231_s2  ;;  %s234_s24 = int_to_ptr.hbm [resolvable:$true] %s233_s24 }
   0xd   :  { %v255_v2 = vpop.eup %254 }
   0xe   :  { %v56_v5 = vmul.f32 4.0, %v255_v2  ;;  %vm60_vm1 = vweird.f32 %v255_v2 }
   0xf   :  { %v36_v8 = vld.sshfl [vmem:[#allocation1] sm:$0xff pattern:$0x75316420]  ;;  %v37_v9 = vld.sshfl [vmem:[#allocation1 + $0x8] sm:$0xff pattern:$0x75316420] }
  0x10   :  { %v57_v7 = vsub.f32 1.0, %v56_v5  ;;  %133 = vperm.xlu0 %253, %v32_v6   ;;  %v41_v10 = vsel %vm40_vm0, %v36_v8, 0.0  ;;  %v48_v11 = vsel %vm40_vm0, %v37_v9, 0.0 }
  0x11   :  { %v42_v12 = vrot.slane %v41_v10, 4  ;;  %v49_v13 = vrot.slane %v48_v11, 4 }
  0x12   :  { %v58_v14 = vmul.f32 %v255_v2, %v57_v7 }
  0x13   :  { %v43_v15 = vadd.f32 %v42_v12, %v41_v10  ;;  %v50_v16 = vadd.f32 %v49_v13, %v48_v11 }
  0x14   :  { %v59_v19 = vadd.f32 %v255_v2, %v58_v14 }
  0x15   :  { %v44_v17 = vrot.slane %v43_v15, 2  ;;  %v51_v18 = vrot.slane %v50_v16, 2 }
  0x16   :  { %v357_v24 = vsel %vm60_vm1, %v255_v2, %v59_v19 }
  0x17   :  { %v45_v20 = vadd.f32 %v44_v17, %v43_v15  ;;  %v52_v21 = vadd.f32 %v51_v18, %v50_v16 }
  0x19   :  { %v46_v22 = vrot.slane %v45_v20, 1  ;;  %v53_v23 = vrot.slane %v52_v21, 1 }
  0x1b   :  { %v47_v25 = vadd.f32 %v46_v22, %v45_v20  ;;  %v54_v26 = vadd.f32 %v53_v23, %v52_v21 }
  0x1d   :  { %v62_v27 = vmul.f32 %v357_v24, %v47_v25  ;;  %v63_v28 = vmul.f32 %v357_v24, %v54_v26 }
  0x1f   :  { %v66_v29 = vrot.slane %v63_v28, 4 }
  0x21   :  { %v67_v30 = vsel %vm40_vm0, %v62_v27, %v66_v29 }
  0x22   :  { %v362_v31 = vsub.f32 %v33_v4, %v67_v30 }
  0x24   :  { %v70_v32 = vmul.f32 %v362_v31, %v362_v31 }
  0x26   :  { %72 = vst [vmem:[#allocation1] ss:$2 sm:$0xff] %v70_v32 }
  0x2d   :  { %v73_v34 = vld.sshfl [vmem:[#allocation1] sm:$0xff pattern:$0x75316420]  ;;  %v74_v35 = vld.sshfl [vmem:[#allocation1 + $0x8] sm:$0xff pattern:$0x75316420] }
  0x2e   :  { %145 = vst [vmem:[#allocation1] ss:$2 sm:$0xff] %v143_v33  ;;  %v84_v36 = vsel %vm40_vm0, %v74_v35, 0.0  ;;  %v77_v44 = vsel %vm40_vm0, %v73_v34, 0.0 }
  0x2f   :  { %v85_v40 = vrot.slane %v84_v36, 4  ;;  %v78_v49 = vrot.slane %v77_v44, 4 }
  0x31   :  { %v86_v47 = vadd.f32 %v85_v40, %v84_v36  ;;  %v79_v55 = vadd.f32 %v78_v49, %v77_v44 }
  0x33   :  { %v87_v53 = vrot.slane %v86_v47, 2  ;;  %v80_v60 = vrot.slane %v79_v55, 2 }
  0x35   :  { %v146_v37 = vld.sshfl [vmem:[#allocation1] sm:$0xff pattern:$0x75316420]  ;;  %v147_v38 = vld.sshfl [vmem:[#allocation1 + $0x8] sm:$0xff pattern:$0x75316420]  ;;  %v88_v59 = vadd.f32 %v87_v53, %v86_v47  ;;  %v81_v1 = vadd.f32 %v80_v60, %v79_v55 }
  0x36   :  { %v150_v39 = vsel %vm40_vm0, %v146_v37, 0.0  ;;  %v157_v42 = vsel %vm40_vm0, %v147_v38, 0.0  ;;  %v321_v60 = vmov 839922192  }
  0x37   :  { %v151_v41 = vrot.slane %v150_v39, 4  ;;  %v158_v43 = vrot.slane %v157_v42, 4  ;;  %v89_v0 = vrot.slane %v88_v59, 1  ;;  %v82_v6 = vrot.slane %v81_v1, 1 }
  0x39   :  { %v152_v45 = vadd.f32 %v151_v41, %v150_v39  ;;  %v159_v46 = vadd.f32 %v158_v43, %v157_v42  ;;  %v90_v4 = vadd.f32 %v89_v0, %v88_v59  ;;  %v83_v8 = vadd.f32 %v82_v6, %v81_v1 }
  0x3b   :  { %v153_v48 = vrot.slane %v152_v45, 2  ;;  %v160_v50 = vrot.slane %v159_v46, 2  ;;  %v92_v7 = vmul.f32 %v90_v4, %v357_v24  ;;  %v91_v10 = vmul.f32 %v83_v8, %v357_v24 }
  0x3d   :  { %v154_v51 = vadd.f32 %v153_v48, %v152_v45  ;;  %v161_v52 = vadd.f32 %v160_v50, %v159_v46  ;;  %v94_v9 = vadd.f32 1e-06, %v92_v7  ;;  %v93_v17 = vadd.f32 1e-06, %v91_v10 }
  0x3f   :  { %v155_v54 = vrot.slane %v154_v51, 1  ;;  %v162_v56 = vrot.slane %v161_v52, 1  ;;  %256 = vrsqrt.f32 %v94_v9  ;;  %vm111_vm2 = vweird.f32 %v94_v9 }
  0x40   :  { %258 = vrsqrt.f32 %v93_v17  ;;  %vm101_vm4 = vweird.f32 %v93_v17 }
  0x41   :  { %v156_v57 = vadd.f32 %v155_v54, %v154_v51  ;;  %v163_v58 = vadd.f32 %v162_v56, %v161_v52 }
  0x43   :  { %v164_v61 = vmul.f32 %v156_v57, %v357_v24  ;;  %v165_v62 = vmul.f32 %v163_v58, %v357_v24 }
  0x45   :  { %v168_v63 = vrot.slane %v165_v62, 4  ;;  %v257_v25 = vpop.eup %256 }
  0x46   :  { %v106_v30 = vmul.f32 %v257_v25, %v94_v9  ;;  %v259_v32 = vpop.eup %258  ;;  %vm112_vm3 = vweird.f32 %v257_v25 }
  0x47   :  { %v169_v2 = vsel %vm40_vm0, %v164_v61, %v168_v63  ;;  %v96_v37 = vmul.f32 %v259_v32, %v93_v17  ;;  %vm102_vm5 = vweird.f32 %v259_v32  ;;  %vm383_vm6 = vmor %vm111_vm2, %vm112_vm3  ;;  %v126_v61 = vunpack.c.l.s4 %v321_v60 }
  0x48   :  { %v373_v3 = vsub.f32 %v143_v33, %v169_v2  ;;  %v107_v38 = vmul.f32 %v257_v25, %v106_v30  ;;  %vm387_vm11 = vmor %vm101_vm4, %vm102_vm5 }
  0x49   :  { %v97_v39 = vmul.f32 %v259_v32, %v96_v37 }
  0x4a   :  { %v172_v5 = vmul.f32 %v373_v3, %v373_v3  ;;  %v108_v40 = vmul.f32 0.5, %v107_v38 }
  0x4b   :  { %v98_v43 = vmul.f32 0.5, %v97_v39 }
  0x4c   :  { %174 = vst [vmem:[#allocation1] ss:$2 sm:$0xff] %v172_v5  ;;  %v109_v44 = vsub.f32 1.5, %v108_v40  ;;  %v127_v5 = vunpack.c.0.s8 %v126_v61 }
  0x4e   :  { %v110_v49 = vmul.f32 %v257_v25, %v109_v44 }
  0x50   :  { %v114_v57 = vsel %vm383_vm6, %v257_v25, %v110_v49 }
  0x51   :  { %v117_v62 = vrot.slane %v114_v57, 4 }
  0x53   :  { %v175_v11 = vld.sshfl [vmem:[#allocation1] sm:$0xff pattern:$0x75316420]  ;;  %v176_v12 = vld.sshfl [vmem:[#allocation1 + $0x8] sm:$0xff pattern:$0x75316420] }
  0x54   :  { %v179_v13 = vsel %vm40_vm0, %v175_v11, 0.0  ;;  %v186_v14 = vsel %vm40_vm0, %v176_v12, 0.0 }
  0x55   :  { %v180_v15 = vrot.slane %v179_v13, 4  ;;  %v187_v16 = vrot.slane %v186_v14, 4 }
  0x57   :  { %v181_v18 = vadd.f32 %v180_v15, %v179_v13  ;;  %v188_v19 = vadd.f32 %v187_v16, %v186_v14 }
  0x59   :  { %v182_v20 = vrot.slane %v181_v18, 2  ;;  %v189_v21 = vrot.slane %v188_v19, 2 }
  0x5b   :  { %v183_v22 = vadd.f32 %v182_v20, %v181_v18  ;;  %v190_v23 = vadd.f32 %v189_v21, %v188_v19 }
  0x5d   :  { %v184_v26 = vrot.slane %v183_v22, 1  ;;  %v191_v27 = vrot.slane %v190_v23, 1 }
  0x5f   :  { %v185_v28 = vadd.f32 %v184_v26, %v183_v22  ;;  %v192_v29 = vadd.f32 %v191_v27, %v190_v23 }
  0x61   :  { %v193_v33 = vmul.f32 %v185_v28, %v357_v24  ;;  %v194_v34 = vmul.f32 %v192_v29, %v357_v24  ;;  %v99_v24 = vsub.f32 1.5, %v98_v43 }
  0x63   :  { %v195_v35 = vadd.f32 1e-06, %v193_v33  ;;  %v196_v36 = vadd.f32 1e-06, %v194_v34  ;;  %v100_v56 = vmul.f32 %v259_v32, %v99_v24 }
  0x65   :  { %260 = vrsqrt.f32 %v195_v35  ;;  %vm213_vm7 = vweird.f32 %v196_v36  ;;  %vm203_vm9 = vweird.f32 %v195_v35  ;;  %v104_v0 = vsel %vm387_vm11, %v259_v32, %v100_v56 }
  0x66   :  { %262 = vrsqrt.f32 %v196_v36  ;;  %v118_v6 = vsel %vm40_vm0, %v104_v0, %v117_v62 }
  0x67   :  { %v120_v8 = vmul.f32 %v118_v6, %v362_v31 }
  0x6b   :  { %v261_v41 = vpop.eup %260 }
  0x6c   :  { %v263_v42 = vpop.eup %262  ;;  %v198_v45 = vmul.f32 %v261_v41, %v195_v35  ;;  %vm204_vm10 = vweird.f32 %v261_v41 }
  0x6d   :  { %v208_v46 = vmul.f32 %v263_v42, %v196_v36  ;;  %vm214_vm8 = vweird.f32 %v263_v42  ;;  %vm205_vm13 = vmor %vm203_vm9, %vm204_vm10 }
  0x6e   :  { %v199_v47 = vmul.f32 %v261_v41, %v198_v45  ;;  %vm215_vm12 = vmor %vm213_vm7, %vm214_vm8 }
  0x6f   :  { %v209_v48 = vmul.f32 %v263_v42, %v208_v46 }
  0x70   :  { %v200_v50 = vmul.f32 0.5, %v199_v47 }
  0x71   :  { %v210_v52 = vmul.f32 0.5, %v209_v48 }
  0x72   :  { %v201_v53 = vsub.f32 1.5, %v200_v50 }
  0x73   :  { %v211_v55 = vsub.f32 1.5, %v210_v52 }
  0x74   :  { %v202_v58 = vmul.f32 %v261_v41, %v201_v53 }
  0x75   :  { %v212_v59 = vmul.f32 %v263_v42, %v211_v55 }
  0x76   :  { %v206_v1 = vsel %vm205_vm13, %v261_v41, %v202_v58 }
  0x77   :  { %v216_v63 = vsel %vm215_vm12, %v263_v42, %v212_v59 }
  0x78   :  { %v219_v2 = vrot.slane %v216_v63, 4 }
  0x7a   :  { %v124_v4 = vpop.permute.xlu0 %123  ;;  %v220_v7 = vsel %vm40_vm0, %v206_v1, %v219_v2 }
  0x7b   :  { %v222_v9 = vmul.f32 %v220_v7, %v373_v3  ;;  %v128_v10 = vperm.slane %v124_v4, %v127_v5 }
  0x7d   :  { %v130_v12 = vmul.f32 %v128_v10, %v120_v8  ;;  %v223_v13 = vmul.f32 %v222_v9, %v128_v10 }
  0x82   :  { %v134_v11 = vpop.permute.xlu0 %133 }
  0x83   :  { %v138_v14 = vperm.slane %v134_v11, %v127_v5 }
  0x85   :  { %v140_v15 = vadd.f32 %v138_v14, %v130_v12  ;;  %v224_v16 = vadd.f32 %v223_v13, %v138_v14 }
  0x87   :  { %141 = vst [vmem:[#allocation5] sm:$0xff] %v140_v15 }
  0x88   :  { %226 = vst [vmem:[#allocation5 + $0x8] sm:$0xff] %v224_v16 }
  0x89   :  { %239 = dma.vmem_to_hbm [thread:$0]  %s232_s2, 256, %s234_s24, [#allocation4], %s317_s17, %s317_s17, %s318_s18  }
  0x8a   :  { %314 = dma.done.wait [#allocation4], 256  }
  0x8b   :  { %315 = vsyncadd [#allocation4], 4294967040 }
  0x8c   :  { %244 = vsyncpa [#allocation3], 1 }
  0x8d   :  { %245 = vsyncpa [#allocation4], 1 }

</bundles_post_ra>
